<compile_context>
chip_gen: v7x
topology: tpu7x:2x2x1
jax: 0.10.0
libtpu: 0.0.40
codegen_flags: <defaults>
</compile_context>

<pallas_src>
import jax
import jax.numpy as jnp
from jax.experimental import pallas as pl
from jax.experimental.pallas import tpu as pltpu


def mlp_kernel(x_ref, w1_ref, b1_ref, w2_ref, b2_ref, w3_ref, b3_ref, o_ref):
    # x_ref:  (1, TB)  f32   batch on lanes
    # w1_ref: (H1, 1)  f32   b1_ref: (H1, 1) f32
    # w2_ref: (H2, H1) bf16  b2_ref: (H2, 1) f32
    # w3_ref: (H2, 1)  f32   b3_ref: (1, 1)  f32 scalar in SMEM
    x = x_ref[...]                                              # (1, TB)

    # fc1: contraction over K=1 -> pure VPU broadcast multiply (no MXU bubble).
    h1 = jnp.maximum(w1_ref[...] * x + b1_ref[...], 0.0)       # (H1, TB) f32

    # fc2: the only real contraction -> ONE bf16 MXU pass, f32 accumulation.
    h2 = jnp.dot(w2_ref[...], h1.astype(jnp.bfloat16),
                 preferred_element_type=jnp.float32)            # (H2, TB) f32
    # Bias + ReLU stay on the VPU: folding b2 into the matmul (K 16->17) would
    # cost a third 8-row MXU push chunk and is a net pessimization.
    h2 = jnp.maximum(h2 + b2_ref[...], 0.0)                    # (H2, TB)

    # fc3: N=1 output column -> VPU multiply + sublane (XLU) reduce, scalar b3.
    out = jnp.sum(h2 * w3_ref[...], axis=0, keepdims=True) + b3_ref[0, 0]
    o_ref[...] = out.astype(o_ref.dtype)                       # (1, TB)


def simple_module_forward(x, params, block_b=32768):
    """x: (B, 1) float32. Returns (B, 1) float32 (same semantics as the module)."""
    w1, b1, w2, b2, w3, b3 = params
    B = x.shape[0]
    H1 = w1.shape[1]   # 16
    H2 = w2.shape[1]   # 32

    # Layout plumbing (wrapper side): batch -> lane axis, weights -> columns.
    x_t = x.reshape(1, B)                     # (1, B)  lane-dense in batch
    w1_c = w1.reshape(H1, 1)                  # (16, 1)
    b1_c = b1.reshape(H1, 1)                  # (16, 1)
    w2_t = w2.T.astype(jnp.bfloat16)          # (32, 16) bf16 -> single MXU pass
    b2_c = b2.reshape(H2, 1)                  # (32, 1)
    w3_c = w3.reshape(H2, 1)                  # (32, 1)
    b3_s = b3.reshape(1, 1)                   # scalar for SMEM

    # Batch tile:
    #   B <= 256  -> one step (128-lane granularity makes splitting pointless),
    #   otherwise -> at least 2 grid steps (v7x megacore), 128-aligned, capped
    #                at block_b (32K lanes ~ 15-20 MiB/step VMEM; fits v7x's
    #                64 MiB physical and v5e/v6e once the scoped limit is raised).
    if B <= 256:
        tb = B
    else:
        half = pl.cdiv(B, 2)
        tb = min(block_b, ((half + 127) // 128) * 128)
    grid = (pl.cdiv(B, tb),)

    out_t = pl.pallas_call(
        mlp_kernel,
        out_shape=jax.ShapeDtypeStruct((1, B), jnp.float32),
        grid_spec=pltpu.PrefetchScalarGridSpec(
            num_scalar_prefetch=0,
            grid=grid,
            in_specs=[
                pl.BlockSpec((1, tb), lambda i: (0, i)),        # x (streamed)
                pl.BlockSpec((H1, 1), lambda i: (0, 0)),        # w1 (resident)
                pl.BlockSpec((H1, 1), lambda i: (0, 0)),        # b1
                pl.BlockSpec((H2, H1), lambda i: (0, 0)),       # w2^T (bf16)
                pl.BlockSpec((H2, 1), lambda i: (0, 0)),        # b2
                pl.BlockSpec((H2, 1), lambda i: (0, 0)),        # w3
                pl.BlockSpec(memory_space=pltpu.MemorySpace.SMEM),  # b3 scalar
            ],
            out_specs=pl.BlockSpec((1, tb), lambda i: (0, i)),
        ),
        compiler_params=pltpu.CompilerParams(
            dimension_semantics=("parallel",),
            vmem_limit_bytes=48 * 1024 * 1024,
        ),
    )(x_t, w1_c, b1_c, w2_t, b2_c, w3_c, b3_s)

    return out_t.reshape(B, 1)


def init_params(key, hidden_shape=16, hidden_shape_2=32):
    # Deterministic init mimicking torch.nn.Linear's uniform(-1/sqrt(fan_in), ...)
    ks = jax.random.split(key, 6)

    def uniform(k, shape, fan_in):
        bound = 1.0 / jnp.sqrt(float(fan_in))
        return jax.random.uniform(k, shape, jnp.float32, -bound, bound)

    w1 = uniform(ks[0], (1, hidden_shape), 1)
    b1 = uniform(ks[1], (1, hidden_shape), 1)
    w2 = uniform(ks[2], (hidden_shape, hidden_shape_2), hidden_shape)
    b2 = uniform(ks[3], (1, hidden_shape_2), hidden_shape)
    w3 = uniform(ks[4], (hidden_shape_2, 1), hidden_shape_2)
    b3 = uniform(ks[5], (1, 1), hidden_shape_2)
    return (w1, b1, w2, b2, w3, b3)


def reference_forward(x, params, fc2_bf16=False):
    """Pure-JAX reference.  fc1/fc3 are written elementwise (exact f32) so the
    comparison is not polluted by XLA's own reduced-precision f32 matmuls."""
    w1, b1, w2, b2, w3, b3 = params
    h1 = jnp.maximum(x * w1 + b1, 0.0)                          # (B, 16)
    if fc2_bf16:   # numerics matched to the kernel's single-pass bf16 fc2
        h2 = jnp.dot(h1.astype(jnp.bfloat16), w2.astype(jnp.bfloat16),
                     preferred_element_type=jnp.float32)
    else:          # true f32 fc2
        h2 = jnp.dot(h1, w2, precision=jax.lax.Precision.HIGHEST)
    h2 = jnp.maximum(h2 + b2, 0.0)                              # (B, 32)
    return jnp.sum(h2 * w3.T, axis=-1, keepdims=True) + b3      # (B, 1)


if __name__ == "__main__":
    key = jax.random.PRNGKey(0)
    k_x, k_p, k_x2 = jax.random.split(key, 3)
    params = init_params(k_p, hidden_shape=16, hidden_shape_2=32)

    # Small smoke test (single grid step).
    B = 8
    x = jax.random.normal(k_x, (B, 1), jnp.float32)
    out = simple_module_forward(x, params)
    jax.block_until_ready(out)
    assert out.shape == (B, 1)
    # Tight check vs a numerics-matched (bf16-fc2) reference.
    assert jnp.allclose(out, reference_forward(x, params, fc2_bf16=True),
                        atol=1e-4, rtol=1e-4)
    # Accuracy-budget check vs the full-f32 reference (bf16 fc2 => ~1e-3 rel).
    assert jnp.allclose(out, reference_forward(x, params, fc2_bf16=False),
                        atol=2e-2, rtol=2e-2)

    # Multi-step ragged path: grid of 2 "parallel" steps, masked tail lanes.
    B2 = 300
    x2 = jax.random.normal(k_x2, (B2, 1), jnp.float32)
    out2 = simple_module_forward(x2, params)
    jax.block_until_ready(out2)
    assert out2.shape == (B2, 1)
    assert jnp.allclose(out2, reference_forward(x2, params, fc2_bf16=True),
                        atol=1e-4, rtol=1e-4)
    assert jnp.allclose(out2, reference_forward(x2, params, fc2_bf16=False),
                        atol=2e-2, rtol=2e-2)

    print("KERNEL_OK")
</pallas_src>

<mosaic_0001>
module attributes {stable_mosaic.version = 11 : i64} {
  func.func @mlp_kernel(%arg0: i32, %arg1: memref<1x8xf32, #tpu.memory_space<vmem>>, %arg2: memref<16x1xf32, #tpu.memory_space<vmem>>, %arg3: memref<16x1xf32, #tpu.memory_space<vmem>>, %arg4: memref<32x16xbf16, #tpu.memory_space<vmem>>, %arg5: memref<32x1xf32, #tpu.memory_space<vmem>>, %arg6: memref<32x1xf32, #tpu.memory_space<vmem>>, %arg7: memref<1x1xf32, #tpu.memory_space<smem>>, %arg8: memref<1x8xf32, #tpu.memory_space<vmem>>) attributes {dimension_semantics = [#tpu.dimension_semantics<parallel>], iteration_bounds = array<i64: 1>, scalar_prefetch = 0 : i64, scratch_operands = 0 : i64, tpu.core_type = #tpu.core_type<tc>, window_params = [{transform_indices = @transform_0, window_bounds = array<i64: 1, 8>}, {pipeline_mode = #tpu.pipeline_mode<synchronous>, transform_indices = @transform_1, window_bounds = array<i64: 16, 1>}, {pipeline_mode = #tpu.pipeline_mode<synchronous>, transform_indices = @transform_2, window_bounds = array<i64: 16, 1>}, {pipeline_mode = #tpu.pipeline_mode<synchronous>, transform_indices = @transform_3, window_bounds = array<i64: 32, 16>}, {pipeline_mode = #tpu.pipeline_mode<synchronous>, transform_indices = @transform_4, window_bounds = array<i64: 32, 1>}, {pipeline_mode = #tpu.pipeline_mode<synchronous>, transform_indices = @transform_5, window_bounds = array<i64: 32, 1>}, {transform_indices = @transform_6, window_bounds = array<i64: 1, 1>}, {transform_indices = @transform_7, window_bounds = array<i64: 1, 8>}]} {
    %c0 = arith.constant 0 : index
    %c0_0 = arith.constant 0 : index
    %0 = vector.load %arg1[%c0, %c0_0] : memref<1x8xf32, #tpu.memory_space<vmem>>, vector<1x8xf32>
    %c0_1 = arith.constant 0 : index
    %c0_2 = arith.constant 0 : index
    %1 = vector.load %arg2[%c0_1, %c0_2] : memref<16x1xf32, #tpu.memory_space<vmem>>, vector<16x1xf32>
    %2 = vector.broadcast %1 : vector<16x1xf32> to vector<16x8xf32>
    %3 = vector.broadcast %0 : vector<1x8xf32> to vector<16x8xf32>
    %4 = arith.mulf %2, %3 : vector<16x8xf32>
    %c0_3 = arith.constant 0 : index
    %c0_4 = arith.constant 0 : index
    %5 = vector.load %arg3[%c0_3, %c0_4] : memref<16x1xf32, #tpu.memory_space<vmem>>, vector<16x1xf32>
    %6 = vector.broadcast %5 : vector<16x1xf32> to vector<16x8xf32>
    %7 = arith.addf %4, %6 : vector<16x8xf32>
    %cst = arith.constant 0.000000e+00 : f32
    %8 = vector.broadcast %cst : f32 to vector<16x8xf32>
    %9 = arith.maximumf %7, %8 : vector<16x8xf32>
    %c0_5 = arith.constant 0 : index
    %c0_6 = arith.constant 0 : index
    %10 = vector.load %arg4[%c0_5, %c0_6] : memref<32x16xbf16, #tpu.memory_space<vmem>>, vector<32x16xbf16>
    %11 = arith.truncf %9 : vector<16x8xf32> to vector<16x8xbf16>
    %cst_7 = arith.constant dense<0.000000e+00> : vector<32x8xf32>
    %12 = tpu.matmul %10, %11, %cst_7 {dimension_numbers = #tpu.dot_dimension_numbers<[1], [0], [0], [1], [0, 0, 1, 1], [], []>} : vector<32x16xbf16>, vector<16x8xbf16>, vector<32x8xf32> -> vector<32x8xf32>
    %c0_8 = arith.constant 0 : index
    %c0_9 = arith.constant 0 : index
    %13 = vector.load %arg5[%c0_8, %c0_9] : memref<32x1xf32, #tpu.memory_space<vmem>>, vector<32x1xf32>
    %14 = vector.broadcast %13 : vector<32x1xf32> to vector<32x8xf32>
    %15 = arith.addf %12, %14 : vector<32x8xf32>
    %cst_10 = arith.constant 0.000000e+00 : f32
    %16 = vector.broadcast %cst_10 : f32 to vector<32x8xf32>
    %17 = arith.maximumf %15, %16 : vector<32x8xf32>
    %c0_11 = arith.constant 0 : index
    %c0_12 = arith.constant 0 : index
    %18 = vector.load %arg6[%c0_11, %c0_12] : memref<32x1xf32, #tpu.memory_space<vmem>>, vector<32x1xf32>
    %19 = vector.broadcast %18 : vector<32x1xf32> to vector<32x8xf32>
    %20 = arith.mulf %17, %19 : vector<32x8xf32>
    %cst_13 = arith.constant dense<0.000000e+00> : vector<8xf32>
    %21 = vector.multi_reduction <add>, %20, %cst_13 [0] : vector<32x8xf32> to vector<8xf32>
    %22 = vector.shape_cast %21 : vector<8xf32> to vector<1x8xf32>
    %c0_14 = arith.constant 0 : index
    %c0_15 = arith.constant 0 : index
    %23 = memref.load %arg7[%c0_14, %c0_15] : memref<1x1xf32, #tpu.memory_space<smem>>
    %24 = vector.broadcast %23 : f32 to vector<1x8xf32>
    %25 = arith.addf %22, %24 : vector<1x8xf32>
    %c0_16 = arith.constant 0 : index
    %c0_17 = arith.constant 0 : index
    %26 = vector.load %arg8[%c0_16, %c0_17] : memref<1x8xf32, #tpu.memory_space<vmem>>, vector<1x8xf32>
    tpu.vector_store %arg8[%c0_16, %c0_17], %25 {strides = array<i32>} : memref<1x8xf32, #tpu.memory_space<vmem>>, vector<1x8xf32>,
    return
  }
  func.func @transform_0(%arg0: i32) -> (i32, i32) {
    %c0_i32 = arith.constant 0 : i32
    %c0_i32_0 = arith.constant 0 : i32
    return %c0_i32, %arg0 : i32, i32
  }
  func.func @transform_1(%arg0: i32) -> (i32, i32) {
    %c0_i32 = arith.constant 0 : i32
    %c0_i32_0 = arith.constant 0 : i32
    %c0_i32_1 = arith.constant 0 : i32
    return %c0_i32, %c0_i32_0 : i32, i32
  }
  func.func @transform_2(%arg0: i32) -> (i32, i32) {
    %c0_i32 = arith.constant 0 : i32
    %c0_i32_0 = arith.constant 0 : i32
    %c0_i32_1 = arith.constant 0 : i32
    return %c0_i32, %c0_i32_0 : i32, i32
  }
  func.func @transform_3(%arg0: i32) -> (i32, i32) {
    %c0_i32 = arith.constant 0 : i32
    %c0_i32_0 = arith.constant 0 : i32
    %c0_i32_1 = arith.constant 0 : i32
    return %c0_i32, %c0_i32_0 : i32, i32
  }
  func.func @transform_4(%arg0: i32) -> (i32, i32) {
    %c0_i32 = arith.constant 0 : i32
    %c0_i32_0 = arith.constant 0 : i32
    %c0_i32_1 = arith.constant 0 : i32
    return %c0_i32, %c0_i32_0 : i32, i32
  }
  func.func @transform_5(%arg0: i32) -> (i32, i32) {
    %c0_i32 = arith.constant 0 : i32
    %c0_i32_0 = arith.constant 0 : i32
    %c0_i32_1 = arith.constant 0 : i32
    return %c0_i32, %c0_i32_0 : i32, i32
  }
  func.func @transform_6(%arg0: i32) -> (i32, i32) {
    %c0_i32 = arith.constant 0 : i32
    %c0_i32_0 = arith.constant 0 : i32
    %c0_i32_1 = arith.constant 0 : i32
    return %c0_i32, %c0_i32_0 : i32, i32
  }
  func.func @transform_7(%arg0: i32) -> (i32, i32) {
    %c0_i32 = arith.constant 0 : i32
    %c0_i32_0 = arith.constant 0 : i32
    return %c0_i32, %arg0 : i32, i32
  }
}

</mosaic_0001>

<bundles_post_ra>
// kernel: tpu_custom_call.1
= control target key start
LH: loop header
LB: loop body
LE: loop exit
PB: predicated region body
PF: predicated region fallthrough
CT: control target
= control target key end

     0   :  { %v270_v2 = vmov 0   ;;  %s374_s0 = inlined_call_operand.vmem [shape: f32[1,8], index: 0, kind: input, shape index: {}]   ;;  %s375_s1 = inlined_call_operand.vmem [shape: f32[16,1], index: 1, kind: input, shape index: {}]   ;;  %s376_s2 = inlined_call_operand.vmem [shape: f32[16,1], index: 2, kind: input, shape index: {}]   ;;  %s377_s3 = inlined_call_operand.vmem [shape: bf16[32,16], index: 3, kind: input, shape index: {}]   ;;  %s378_s4 = inlined_call_operand.vmem [shape: f32[32,1], index: 4, kind: input, shape index: {}]   ;;  %s379_s5 = inlined_call_operand.vmem [shape: f32[32,1], index: 5, kind: input, shape index: {}]   ;;  %s380_s6 = inlined_call_operand.<no memory space> [shape: f32[1,1], index: 6, kind: input, shape index: {}]   ;;  %s381_s7 = inlined_call_operand.hbm [shape: f32[1,8], index: 7, kind: output, shape index: {}]  }
   0x1   :  { %v50_v0 = vld [vmem:[%s376_s2] sm:$0xff]  ;;  %243 = vset.pattern.permute.xlu1 %v270_v2  ;;  %242 = vset.pattern.permute.xlu0 %v270_v2  ;;  %v51_v3 = vld [vmem:[%s376_s2 + $0x8] sm:$0xff] }
   0x2   :  { %v30_v1 = vld [vmem:[%s375_s1] sm:$0xff]  ;;  %54 = vperm.xlu1 %243, %v50_v0   ;;  %v31_v4 = vld [vmem:[%s375_s1 + $0x8] sm:$0xff] }
   0x3   :  { %34 = vperm.xlu0 %242, %v30_v1  }
   0x4   :  { %13 = vsyncpa [#allocation4], 0  ;;  %v72_v5 = vld [vmem:[%s378_s4 + $0x8] sm:$0xff]  ;;  %v71_v6 = vld [vmem:[%s378_s4] sm:$0xff]  ;;  %vm105_vm0 = vcmask 130048   ;;  %vm193_vm1 = vcmask 64512   ;;  %v208_v63 = vstv %s380_s6 }
   0x5   :  { %v74_v7 = vld [vmem:[%s378_s4 + $0x18] sm:$0xff]  ;;  %v73_v8 = vld [vmem:[%s378_s4 + $0x10] sm:$0xff]  ;;  %v166_v9 = vld [vmem:[%s379_s5 + $0x8] sm:$0xff]  ;;  %s271_s27 = smov [#allocation3]   ;;  %vm210_vm2 = vcmask 57344  }
   0x6   :  { %59 = vperm.xlu1 %243, %v51_v3   ;;  %v165_v10 = vld [vmem:[%s379_s5] sm:$0xff]  ;;  %v168_v12 = vld [vmem:[%s379_s5 + $0x18] sm:$0xff]  ;;  %v167_v13 = vld [vmem:[%s379_s5 + $0x10] sm:$0xff]  ;;  %s218_s28 = sshll.u32 %s271_s27, 4  ;;  %s219_s28 = int_to_ptr.vmem [resolvable:$true] %s218_s28 }
   0x7   :  { %39 = vperm.xlu0 %242, %v31_v4   ;;  %v244_v11 = vld [vmem:[%s377_s3] sm:$0xff]   ;;  %v245_v26 = vld [vmem:[%s377_s3 + $0x8] sm:$0xff]   ;;  %s246_s29 = scalar_lea.vmem %s219_s28, 16  ;;  %s250_s30 = scalar_lea.vmem %s219_s28, 32 }
   0x8   :  { %236 = vmatprep.mubr.msk.bf16.mxu0 %vm105_vm0, %v244_v11  ;;  %v226_v14 = vld [vmem:[%s374_s0] ss:$0 sm:$0xff]  ;;  %p247_p0 = scmp.ne.s32.totalorder %s219_s28, %s246_s29  ;;  %p251_p1 = scmp.lt.s32.totalorder %s219_s28, %s219_s28 }
   0x9   :  { %p252_p2 = scmp.lt.s32.totalorder %s250_s30, %s246_s29 }
   0xa   :  { %82 = vperm.xlu1 %243, %v72_v5  }
   0xb   :  { %77 = vperm.xlu0 %242, %v71_v6   ;;  %p253_p3 = por %p252_p2, %p251_p1 }
   0xd   :  { %p254_p4 = pnand %p253_p3, %p247_p0 }
   0xe   :  { %92 = vperm.xlu1 %243, %v74_v7  }
   0xf   :  { %87 = vperm.xlu0 %242, %v73_v8  }
  0x12   :  { %176 = vperm.xlu1 %243, %v166_v9  }
  0x13   :  { %171 = vperm.xlu0 %242, %v165_v10  }
  0x16   :  { %186 = vperm.xlu1 %243, %v168_v12  }
  0x17   :  { %181 = vperm.xlu0 %242, %v167_v13  }
  0x81   :  { %v55_v15 = vpop.permute.xlu1 %54 }
  0x82   :  { %v35_v16 = vpop.permute.xlu0 %34 }
  0x83   :  { %v48_v17 = vmul.f32 %v226_v14, %v35_v16 }
  0x85   :  { %v62_v19 = vadd.f32 %v55_v15, %v48_v17  ;;  %v60_v21 = vpop.permute.xlu1 %59 }
  0x86   :  { %v40_v18 = vpop.permute.xlu0 %39 }
  0x87   :  { %v49_v20 = vmul.f32 %v226_v14, %v40_v18  ;;  %v64_v23 = vmax.f32 %v62_v19, 0.0 }
  0x89   :  { %v63_v22 = vadd.f32 %v60_v21, %v49_v20  ;;  %v83_v28 = vpop.permute.xlu1 %82 }
  0x8a   :  { %v78_v27 = vpop.permute.xlu0 %77 }
  0x8b   :  { %v65_v24 = vmax.f32 %v63_v22, 0.0 }
  0x8d   :  { %v70_v25 = vpack.c.bf16 %v65_v24, %v64_v23  ;;  %v93_v30 = vpop.permute.xlu1 %92 }
  0x8e   :  { %v88_v29 = vpop.permute.xlu0 %87 }
  0x8f   :  { %234 = vmatprep.subr.bf16.mxu0 %v70_v25 }
  0x90   :  { %235 = vmatpush3.bf16.msra.mxu0 %v70_v25 }
  0x91   :  { %v177_v37 = vpop.permute.xlu1 %176 }
  0x92   :  { %v172_v32 = vpop.permute.xlu0 %171 }
  0x93   :  { %237 = vmatmul.mubr.msk.bf16.vlgmr.msra.gmra.mrb[0].mxu0 %vm105_vm0, %v245_v26 }
  0x95   :  { %v187_v49 = vpop.permute.xlu1 %186 }
  0x96   :  { %v182_v46 = vpop.permute.xlu0 %181 }
 0x166   :  { %v238_v31 = vpop.f32.mrb[0].mxu0 }
 0x167   :  { %v155_v33 = vadd.f32 %v238_v31, %v88_v29  ;;  %v146_v34 = vpop.f32.mrb[1].mxu0 }
 0x168   :  { %v147_v35 = vadd.f32 %v146_v34, %v78_v27  ;;  %v239_v36 = vpop.f32.mrb[2].mxu0 }
 0x169   :  { %v158_v38 = vadd.f32 %v239_v36, %v93_v30  ;;  %v149_v39 = vpop.f32.mrb[3].mxu0  ;;  %v163_v40 = vmax.f32 %v155_v33, 0.0 }
 0x16a   :  { %v161_v41 = vmax.f32 %v147_v35, 0.0  ;;  %v150_v42 = vadd.f32 %v149_v39, %v83_v28 }
 0x16b   :  { %v164_v44 = vmax.f32 %v158_v38, 0.0  ;;  %v191_v47 = vmul.f32 %v182_v46, %v163_v40 }
 0x16c   :  { %v189_v43 = vmul.f32 %v172_v32, %v161_v41  ;;  %v162_v45 = vmax.f32 %v150_v42, 0.0 }
 0x16d   :  { %v192_v51 = vmul.f32 %v187_v49, %v164_v44  ;;  %v197_v54 = vsel %vm193_vm1, %v191_v47, 0.0 }
 0x16e   :  { %v190_v48 = vmul.f32 %v177_v37, %v162_v45  ;;  %v194_v50 = vsel %vm193_vm1, %v189_v43, 0.0 }
 0x16f   :  { %v199_v56 = vsel %vm193_vm1, %v192_v51, 0.0 }
 0x170   :  { %v195_v52 = vsel %vm193_vm1, %v190_v48, 0.0 }
 0x171   :  { %v196_v53 = vadd.f32 %v195_v52, %v194_v50 }
 0x173   :  { %v198_v55 = vadd.f32 %v197_v54, %v196_v53 }
 0x175   :  { %v200_v57 = vadd.f32 %v199_v56, %v198_v55 }
 0x177   :  { %v201_v58 = vrot.slane %v200_v57, 4 }
 0x179   :  { %v202_v59 = vadd.f32 %v201_v58, %v200_v57 }
 0x17b   :  { %v203_v60 = vrot.slane %v202_v59, 2 }
 0x17d   :  { %v204_v61 = vadd.f32 %v203_v60, %v202_v59 }
 0x17f   :  { %v205_v62 = vrot.slane %v204_v61, 1 }
 0x181   :  { %v206_v0 = vadd.f32 %v205_v62, %v204_v61 }
 0x183   :  { %v209_v1 = vadd.f32 %v208_v63, %v206_v0 }
 0x185   :  { %211 = vst.msk [vmem:[#allocation3] sm:$0x1] %vm210_vm2, %v209_v1 }
 0x186   :  { %257 = shalt.err (!%p254_p4)
}
 0x187   :  { %s258_s10 = scalar_lea.hbm %s381_s7, 16 }
 0x188   :  { %p259_p5 = scmp.ne.s32.totalorder %s381_s7, %s258_s10  ;;  %p262_p6 = scmp.lt.u32.totalorder %s258_s10, %s381_s7 }
 0x18a   :  { %p264_p7 = pnand %p262_p6, %p259_p5 }
 0x18c   :  { %267 = shalt.err (!%p264_p7)
}
 0x18d   :  { %221 = dma.vmem_to_hbm [thread:$0]  %s219_s28, 16, %s381_s7, [#allocation4]  }
 0x18e   :  { %268 = dma.done.wait [#allocation4], 16  }
 0x18f   :  { %269 = vsyncadd [#allocation4], 4294967280 }
 0x190   :  { %225 = vsyncpa [#allocation4], 1 }

</bundles_post_ra>
